<compile_context>
chip_gen: v6e
topology: v6e:2x2x1
jax: 0.10.0
libtpu: 0.0.40
codegen_flags: <defaults>
</compile_context>

<pallas_src>
import jax
import jax.numpy as jnp
from jax.experimental import pallas as pl
from jax.experimental.pallas import tpu as pltpu

# ---- synthetic cfg (small shapes) -------------------------------------------
BOTTOMUP_FEAT_DIM = 96   # frcn_feat feature dim
SPT_FEAT_DIM = 33        # bbox_feat feature dim = SPT_FEAT_DIM - 1 = 32
HIDDEN_SIZE = 64
IMGFEAT_LINEAR_SIZE = SPT_FEAT_DIM + BOTTOMUP_FEAT_DIM - 1  # 128


def adapter_kernel(frcn_ref, bbox_ref, w_ref, b_ref, img_ref, abssum_ref,
                   xcat_ref):
    """One row-tile per grid step.

    frcn_ref  : (TR, Df)       input
    bbox_ref  : (TR, Db)       input
    w_ref     : (Df+Db, H)     resident weight (already transposed)
    b_ref     : (1, H)         resident bias
    img_ref   : (TR, H)        output
    abssum_ref: (TR, 1)        output (sum(|frcn|, -1); ==0 compare is glue)
    xcat_ref  : (TR, Df+Db)    VMEM scratch for the fused K=128 contraction
    """
    Df = frcn_ref.shape[-1]
    frcn = frcn_ref[...]

    # Fuse the two partial matmuls into one K = Df + Db = 128 MXU dot.
    xcat_ref[:, :Df] = frcn
    xcat_ref[:, Df:] = bbox_ref[...]
    out = jnp.dot(xcat_ref[...], w_ref[...],
                  preferred_element_type=jnp.float32) + b_ref[...]
    img_ref[...] = out.astype(img_ref.dtype)

    # Cross-lane reduce rides the XLU slot (slack while the MXU is busy).
    abssum_ref[...] = jnp.sum(jnp.abs(frcn), axis=-1,
                              keepdims=True).astype(abssum_ref.dtype)


def prepare_adapter_params(weight, bias):
    """Once-per-model weight prep (hoisted out of the per-call forward path).

    PyTorch nn.Linear stores weight as (H, Df+Db); the kernel wants (Df+Db, H)
    so that  concat(x_f, x_b) @ W_t + b  ==  Linear(concat(x_f, x_b)).
    """
    w_t = jnp.asarray(weight).T                     # (Df+Db, H)
    b2d = jnp.asarray(bias).reshape(1, -1)          # (1, H)
    return w_t, b2d


def adapter_forward(frcn_feat, bbox_feat, w_t, b2d, *, row_tile=256):
    """frcn_feat: (B, N, Df), bbox_feat: (B, N, Db),
       w_t: (Df+Db, H) pre-transposed weight, b2d: (1, H) bias."""
    B, N, Df = frcn_feat.shape
    Db = bbox_feat.shape[-1]
    Dcat, H = w_t.shape
    assert Dcat == Df + Db
    R = B * N

    # Row tiling: TR>=256 amortizes per-grid-step overhead at production sizes;
    # for toy R the whole problem is one block.
    TR = min(row_tile, R)
    grid = (pl.cdiv(R, TR),)

    frcn2d = frcn_feat.reshape(R, Df)
    bbox2d = bbox_feat.reshape(R, Db)
    dtype = frcn2d.dtype   # no forced f32 upcast; feed bf16 on v6e/v7x if desired

    img2d, abssum = pl.pallas_call(
        adapter_kernel,
        out_shape=(
            jax.ShapeDtypeStruct((R, H), dtype),
            jax.ShapeDtypeStruct((R, 1), jnp.float32),
        ),
        grid=grid,
        in_specs=[
            pl.BlockSpec((TR, Df), lambda i: (i, 0)),     # row-tiled
            pl.BlockSpec((TR, Db), lambda i: (i, 0)),     # row-tiled
            pl.BlockSpec((Dcat, H), lambda i: (0, 0)),    # resident weight
            pl.BlockSpec((1, H), lambda i: (0, 0)),       # resident bias
        ],
        out_specs=(
            pl.BlockSpec((TR, H), lambda i: (i, 0)),
            pl.BlockSpec((TR, 1), lambda i: (i, 0)),
        ),
        scratch_shapes=[pltpu.VMEM((TR, Dcat), dtype)],
        compiler_params=pltpu.CompilerParams(
            # Row tiles are independent -> shard across v7x's 2 TCs; no-op on
            # v5e/v6e (single TC).  VMEM use is tiny on all generations.
            dimension_semantics=("parallel",)),
    )(frcn2d, bbox2d, w_t, b2d)

    img_feat = img2d.reshape(B, N, H)
    # (B, N) -> unsqueeze(1).unsqueeze(2) -> (B, 1, 1, N), bool
    img_feat_mask = (abssum.reshape(B, N) == 0.0)[:, None, None, :]
    return img_feat, img_feat_mask


def _init_linear_params(key, in_dim, out_dim):
    """Deterministic init mimicking nn.Linear's uniform(-1/sqrt(in), 1/sqrt(in))."""
    kw, kb = jax.random.split(key)
    bound = 1.0 / jnp.sqrt(jnp.float32(in_dim))
    w = jax.random.uniform(kw, (out_dim, in_dim), jnp.float32, -bound, bound)
    b = jax.random.uniform(kb, (out_dim,), jnp.float32, -bound, bound)
    return w, b


if __name__ == "__main__":
    key = jax.random.PRNGKey(0)
    k_frcn, k_bbox, k_param = jax.random.split(key, 3)

    B, N = 2, 8
    Df, Db = BOTTOMUP_FEAT_DIM, SPT_FEAT_DIM - 1

    frcn_feat = jax.random.normal(k_frcn, (B, N, Df), jnp.float32)
    # zero out some rows so the padding mask is non-trivial
    frcn_feat = frcn_feat.at[0, 5:, :].set(0.0)
    frcn_feat = frcn_feat.at[1, 7:, :].set(0.0)
    bbox_feat = jax.random.normal(k_bbox, (B, N, Db), jnp.float32)

    weight, bias = _init_linear_params(k_param, IMGFEAT_LINEAR_SIZE, HIDDEN_SIZE)

    # Weight prep hoisted out of the forward path (do once per model).
    w_t, b2d = prepare_adapter_params(weight, bias)

    img_feat, img_feat_mask = adapter_forward(frcn_feat, bbox_feat, w_t, b2d)
    jax.block_until_ready((img_feat, img_feat_mask))

    # reference check in plain JAX
    x_cat = jnp.concatenate([frcn_feat, bbox_feat], axis=-1)
    ref_img = x_cat @ weight.T + bias
    ref_mask = (jnp.sum(jnp.abs(frcn_feat), axis=-1) == 0)[:, None, None, :]
    assert img_feat.shape == (B, N, HIDDEN_SIZE)
    assert img_feat_mask.shape == (B, 1, 1, N)
    assert img_feat_mask.dtype == jnp.bool_
    assert jnp.allclose(img_feat, ref_img, atol=1e-5, rtol=1e-5)
    assert bool(jnp.all(img_feat_mask == ref_mask))

    print("KERNEL_OK")
</pallas_src>

<mosaic_0001>
module attributes {stable_mosaic.version = 11 : i64} {
  func.func @adapter_kernel(%arg0: i32, %arg1: memref<16x96xf32, #tpu.memory_space<vmem>>, %arg2: memref<16x32xf32, #tpu.memory_space<vmem>>, %arg3: memref<128x64xf32, #tpu.memory_space<vmem>>, %arg4: memref<1x64xf32, #tpu.memory_space<vmem>>, %arg5: memref<16x64xf32, #tpu.memory_space<vmem>>, %arg6: memref<16x1xf32, #tpu.memory_space<vmem>>, %arg7: memref<16x128xf32, #tpu.memory_space<vmem>>) attributes {dimension_semantics = [#tpu.dimension_semantics<parallel>], iteration_bounds = array<i64: 1>, scalar_prefetch = 0 : i64, scratch_operands = 1 : i64, tpu.core_type = #tpu.core_type<tc>, window_params = [{transform_indices = @transform_0, window_bounds = array<i64: 16, 96>}, {transform_indices = @transform_1, window_bounds = array<i64: 16, 32>}, {pipeline_mode = #tpu.pipeline_mode<synchronous>, transform_indices = @transform_2, window_bounds = array<i64: 128, 64>}, {pipeline_mode = #tpu.pipeline_mode<synchronous>, transform_indices = @transform_3, window_bounds = array<i64: 1, 64>}, {transform_indices = @transform_4, window_bounds = array<i64: 16, 64>}, {transform_indices = @transform_5, window_bounds = array<i64: 16, 1>}]} {
    %c0 = arith.constant 0 : index
    %c0_0 = arith.constant 0 : index
    %0 = vector.load %arg1[%c0, %c0_0] : memref<16x96xf32, #tpu.memory_space<vmem>>, vector<16x96xf32>
    %c0_1 = arith.constant 0 : index
    %c0_2 = arith.constant 0 : index
    %1 = vector.load %arg7[%c0_1, %c0_2] : memref<16x128xf32, #tpu.memory_space<vmem>>, vector<16x96xf32>
    tpu.vector_store %arg7[%c0_1, %c0_2], %0 {strides = array<i32>} : memref<16x128xf32, #tpu.memory_space<vmem>>, vector<16x96xf32>,
    %c0_3 = arith.constant 0 : index
    %c0_4 = arith.constant 0 : index
    %2 = vector.load %arg2[%c0_3, %c0_4] : memref<16x32xf32, #tpu.memory_space<vmem>>, vector<16x32xf32>
    %c0_5 = arith.constant 0 : index
    %c96 = arith.constant 96 : index
    %3 = vector.load %arg7[%c0_5, %c96] : memref<16x128xf32, #tpu.memory_space<vmem>>, vector<16x32xf32>
    tpu.vector_store %arg7[%c0_5, %c96], %2 {strides = array<i32>} : memref<16x128xf32, #tpu.memory_space<vmem>>, vector<16x32xf32>,
    %c0_6 = arith.constant 0 : index
    %c0_7 = arith.constant 0 : index
    %4 = vector.load %arg7[%c0_6, %c0_7] : memref<16x128xf32, #tpu.memory_space<vmem>>, vector<16x128xf32>
    %c0_8 = arith.constant 0 : index
    %c0_9 = arith.constant 0 : index
    %5 = vector.load %arg3[%c0_8, %c0_9] : memref<128x64xf32, #tpu.memory_space<vmem>>, vector<128x64xf32>
    %cst = arith.constant dense<0.000000e+00> : vector<16x64xf32>
    %6 = tpu.matmul %4, %5, %cst {dimension_numbers = #tpu.dot_dimension_numbers<[1], [0], [0], [1], [0, 0, 1, 1], [], []>} : vector<16x128xf32>, vector<128x64xf32>, vector<16x64xf32> -> vector<16x64xf32>
    %c0_10 = arith.constant 0 : index
    %c0_11 = arith.constant 0 : index
    %7 = vector.load %arg4[%c0_10, %c0_11] : memref<1x64xf32, #tpu.memory_space<vmem>>, vector<1x64xf32>
    %8 = vector.broadcast %7 : vector<1x64xf32> to vector<16x64xf32>
    %9 = arith.addf %6, %8 : vector<16x64xf32>
    %c0_12 = arith.constant 0 : index
    %c0_13 = arith.constant 0 : index
    %10 = vector.load %arg5[%c0_12, %c0_13] : memref<16x64xf32, #tpu.memory_space<vmem>>, vector<16x64xf32>
    tpu.vector_store %arg5[%c0_12, %c0_13], %9 {strides = array<i32>} : memref<16x64xf32, #tpu.memory_space<vmem>>, vector<16x64xf32>,
    %11 = math.absf %0 : vector<16x96xf32>
    %cst_14 = arith.constant dense<0.000000e+00> : vector<16xf32>
    %12 = vector.multi_reduction <add>, %11, %cst_14 [1] : vector<16x96xf32> to vector<16xf32>
    %13 = vector.shape_cast %12 : vector<16xf32> to vector<16x1xf32>
    %c0_15 = arith.constant 0 : index
    %c0_16 = arith.constant 0 : index
    %14 = vector.load %arg6[%c0_15, %c0_16] : memref<16x1xf32, #tpu.memory_space<vmem>>, vector<16x1xf32>
    tpu.vector_store %arg6[%c0_15, %c0_16], %13 {strides = array<i32>} : memref<16x1xf32, #tpu.memory_space<vmem>>, vector<16x1xf32>,
    return
  }
  func.func @transform_0(%arg0: i32) -> (i32, i32) {
    %c0_i32 = arith.constant 0 : i32
    %c0_i32_0 = arith.constant 0 : i32
    return %arg0, %c0_i32 : i32, i32
  }
  func.func @transform_1(%arg0: i32) -> (i32, i32) {
    %c0_i32 = arith.constant 0 : i32
    %c0_i32_0 = arith.constant 0 : i32
    return %arg0, %c0_i32 : i32, i32
  }
  func.func @transform_2(%arg0: i32) -> (i32, i32) {
    %c0_i32 = arith.constant 0 : i32
    %c0_i32_0 = arith.constant 0 : i32
    %c0_i32_1 = arith.constant 0 : i32
    return %c0_i32, %c0_i32_0 : i32, i32
  }
  func.func @transform_3(%arg0: i32) -> (i32, i32) {
    %c0_i32 = arith.constant 0 : i32
    %c0_i32_0 = arith.constant 0 : i32
    %c0_i32_1 = arith.constant 0 : i32
    return %c0_i32, %c0_i32_0 : i32, i32
  }
  func.func @transform_4(%arg0: i32) -> (i32, i32) {
    %c0_i32 = arith.constant 0 : i32
    %c0_i32_0 = arith.constant 0 : i32
    return %arg0, %c0_i32 : i32, i32
  }
  func.func @transform_5(%arg0: i32) -> (i32, i32) {
    %c0_i32 = arith.constant 0 : i32
    %c0_i32_0 = arith.constant 0 : i32
    return %arg0, %c0_i32 : i32, i32
  }
}

</mosaic_0001>

<bundles_post_ra>
// kernel: tpu_custom_call.1
= control target key start
LH: loop header
LB: loop body
LE: loop exit
PB: predicated region body
PF: predicated region fallthrough
CT: control target
= control target key end

     0   :  { %s252_s22 = smov 96   ;;  %vm22_vm0 = vcmask 785408   ;;  %s362_s0 = inlined_call_operand.vmem [shape: f32[16,96], index: 0, kind: input, shape index: {}]   ;;  %s363_s1 = inlined_call_operand.vmem [shape: f32[16,32], index: 1, kind: input, shape index: {}]   ;;  %s364_s2 = inlined_call_operand.vmem [shape: f32[128,64], index: 2, kind: input, shape index: {}]   ;;  %s365_s3 = inlined_call_operand.vmem [shape: f32[1,64], index: 3, kind: input, shape index: {}]   ;;  %s366_s4 = inlined_call_operand.hbm [shape: f32[16,64], index: 4, kind: output, shape index: {0}]   ;;  %s367_s5 = inlined_call_operand.vmem [shape: f32[16,1], index: 5, kind: output, shape index: {1}]  }
   0x1   :  { %v25_v0 = vld [vmem:[%s363_s1] sm:$0xff]  ;;  %v55_v1 = vld [vmem:[%s364_s2 + $0x78] sm:$0xff]  ;;  %v54_v2 = vld [vmem:[%s364_s2 + $0x70] sm:$0xff] }
   0x2   :  { %29 = vrot.lane.b32.xlu0 %v25_v0, %s252_s22  ;;  %191 = vmatprep.subr.mxu0 %v55_v1  ;;  %v26_v3 = vld [vmem:[%s363_s1 + $0x8] sm:$0xff]  ;;  %v52_v5 = vld [vmem:[%s364_s2 + $0x60] sm:$0xff]  ;;  %v51_v9 = vld [vmem:[%s364_s2 + $0x58] sm:$0xff] }
   0x3   :  { %192 = vmatpush3.msra.mxu0 %v55_v1  ;;  %v53_v4 = vld [vmem:[%s364_s2 + $0x68] sm:$0xff]  ;;  %v20_v6 = vld [vmem:[%s362_s0] sm:$0xff] }
   0x4   :  { %193 = vmatprep.subr.mxu0 %v54_v2  ;;  %23 = vst.msk [vmem:[#allocation2] sm:$0xff] %vm22_vm0, %v20_v6  ;;  %v21_v7 = vld [vmem:[%s362_s0 + $0x8] sm:$0xff]  ;;  %v141_v8 = vand.u32 2147483647, %v20_v6 }
   0x5   :  { %194 = vmatpush3.msra.mxu0 %v54_v2  ;;  %24 = vst.msk [vmem:[#allocation2 + $0x8] sm:$0xff] %vm22_vm0, %v21_v7  ;;  %v142_v10 = vand.u32 2147483647, %v21_v7 }
   0x6   :  { %31 = vrot.lane.b32.xlu0 %v26_v3, %s252_s22  ;;  %195 = vmatprep.subr.mxu0 %v53_v4 }
   0x7   :  { %196 = vmatpush3.msra.mxu0 %v53_v4 }
   0x8   :  { %11 = vsyncpa [#allocation4], 0  ;;  %197 = vmatprep.subr.mxu0 %v52_v5  ;;  %v143_v11 = vsel %vm22_vm0, %v141_v8, 0.0  ;;  %v50_v12 = vld [vmem:[%s364_s2 + $0x50] sm:$0xff]  ;;  %v146_v13 = vsel %vm22_vm0, %v142_v10, 0.0  ;;  %v49_v14 = vld [vmem:[%s364_s2 + $0x48] sm:$0xff] }
   0x9   :  { %198 = vmatpush3.msra.mxu0 %v52_v5  ;;  %144 = vadd.xlane.f32.xlu1 %v143_v11  ;;  %v48_v15 = vld [vmem:[%s364_s2 + $0x40] sm:$0xff]  ;;  %v47_v16 = vld [vmem:[%s364_s2 + $0x38] sm:$0xff]  ;;  %v46_v17 = vld [vmem:[%s364_s2 + $0x30] sm:$0xff]  ;;  %vm35_vm1 = vcmask 1048320   ;;  %vm149_vm2 = vcmask 7168   ;;  %s253_s11 = smov [#allocation3]  }
   0xa   :  { %199 = vmatprep.subr.mxu0 %v51_v9  ;;  %v45_v18 = vld [vmem:[%s364_s2 + $0x28] sm:$0xff]  ;;  %v44_v19 = vld [vmem:[%s364_s2 + $0x20] sm:$0xff]  ;;  %v43_v20 = vld [vmem:[%s364_s2 + $0x18] sm:$0xff]  ;;  %s157_s12 = sshll.u32 %s253_s11, 4  ;;  %vm138_vm3 = vcmask 523264   ;;  %s158_s12 = int_to_ptr.vmem [resolvable:$true] %s157_s12 }
   0xb   :  { %200 = vmatpush3.msra.mxu0 %v51_v9  ;;  %v42_v21 = vld [vmem:[%s364_s2 + $0x10] sm:$0xff]  ;;  %v41_v22 = vld [vmem:[%s364_s2 + $0x8] sm:$0xff]  ;;  %v40_v23 = vld [vmem:[%s364_s2] sm:$0xff]  ;;  %s230_s0 = scalar_lea.vmem %s158_s12, 256  ;;  %p235_p1 = scmp.lt.s32.totalorder %s158_s12, %s158_s12 }
   0xc   :  { %201 = vmatprep.subr.mxu0 %v50_v12  ;;  %v172_v30 = vld [vmem:[%s365_s3] ss:$0 sm:$0xff]  ;;  %p231_p0 = scmp.ne.s32.totalorder %s158_s12, %s230_s0  ;;  %p236_p2 = scmp.lt.s32.totalorder %s230_s0, %s230_s0 }
   0xd   :  { %202 = vmatpush3.msra.mxu0 %v50_v12  ;;  %147 = vadd.xlane.f32.xlu1 %v146_v13 }
   0xe   :  { %203 = vmatprep.subr.mxu0 %v49_v14  ;;  %p237_p3 = por %p236_p2, %p235_p1 }
   0xf   :  { %204 = vmatpush3.msra.mxu0 %v49_v14 }
  0x10   :  { %205 = vmatprep.subr.mxu0 %v48_v15  ;;  %p238_p4 = pnand %p237_p3, %p231_p0 }
  0x11   :  { %206 = vmatpush3.msra.mxu0 %v48_v15 }
  0x12   :  { %207 = vmatprep.subr.mxu0 %v47_v16 }
  0x13   :  { %208 = vmatpush3.msra.mxu0 %v47_v16 }
  0x14   :  { %209 = vmatprep.subr.mxu0 %v46_v17 }
  0x15   :  { %210 = vmatpush3.msra.mxu0 %v46_v17 }
  0x16   :  { %211 = vmatprep.subr.mxu0 %v45_v18 }
  0x17   :  { %212 = vmatpush3.msra.mxu0 %v45_v18 }
  0x18   :  { %213 = vmatprep.subr.mxu0 %v44_v19 }
  0x19   :  { %214 = vmatpush3.msra.mxu0 %v44_v19 }
  0x1a   :  { %215 = vmatprep.subr.mxu0 %v43_v20 }
  0x1b   :  { %216 = vmatpush3.msra.mxu0 %v43_v20 }
  0x1c   :  { %217 = vmatprep.subr.mxu0 %v42_v21 }
  0x1d   :  { %218 = vmatpush3.msra.mxu0 %v42_v21 }
  0x1e   :  { %219 = vmatprep.subr.mxu0 %v41_v22 }
  0x1f   :  { %220 = vmatpush3.msra.mxu0 %v41_v22 }
  0x20   :  { %221 = vmatprep.subr.mxu0 %v40_v23 }
  0x21   :  { %222 = vmatpush3.msra.mxu0 %v40_v23 }
  0x74   :  { %v30_v24 = vpop.permute.xlu0 %29 }
  0x75   :  { %36 = vst.msk [vmem:[#allocation2] sm:$0xff] %vm35_vm1, %v30_v24 }
  0x78   :  { %v32_v25 = vpop.permute.xlu0 %31 }
  0x79   :  { %37 = vst.msk [vmem:[#allocation2 + $0x8] sm:$0xff] %vm35_vm1, %v32_v25 }
  0x7c   :  { %v38_v26 = vld [vmem:[#allocation2] sm:$0xff] }
  0x7d   :  { %223 = vmatprep.mubr.f32.mxu0 %v38_v26 }
  0x80   :  { %v39_v27 = vld [vmem:[#allocation2 + $0x8] sm:$0xff] }
  0x81   :  { %224 = vmatmul.mubr.f32.vlgmr.msra.gmra.mxu0 %v39_v27 }
  0x92   :  { %v145_v28 = vpop.xlane.xlu1 %144 }
  0x93   :  { %150 = vst.msk [vmem:[%s367_s5] sm:$0xff] %vm149_vm2, %v145_v28 }
  0x96   :  { %v148_v29 = vpop.xlane.xlu1 %147 }
  0x97   :  { %151 = vst.msk [vmem:[%s367_s5 + $0x8] sm:$0xff] %vm149_vm2, %v148_v29 }
 0x141   :  { %v225_v31 = vpop.f32.mrf.mxu0 }
 0x142   :  { %v135_v32 = vadd.f32 %v225_v31, %v172_v30 }
 0x143   :  { %v129_v33 = vpop.f32.mrf.mxu0 }
 0x144   :  { %140 = vst.msk [vmem:[#allocation3 + $0x8] sm:$0xff] %vm138_vm3, %v135_v32  ;;  %v130_v34 = vadd.f32 %v172_v30, %v129_v33 }
 0x146   :  { %139 = vst.msk [vmem:[#allocation3] sm:$0xff] %vm138_vm3, %v130_v34 }
 0x147   :  { %241 = shalt.err (!%p238_p4)
}
 0x148   :  { %s254_s5 = smov 128   ;;  %s255_s13 = smov 8  }
 0x149   :  { %163 = dma.vmem_to_hbm [thread:$0]  %s158_s12, 256, %s366_s4, [#allocation4], %s254_s5, %s254_s5, %s255_s13  }
 0x14a   :  { %250 = dma.done.wait [#allocation4], 256  }
 0x14b   :  { %251 = vsyncadd [#allocation4], 4294967040 }
 0x14c   :  { %171 = vsyncpa [#allocation4], 1 }

</bundles_post_ra>
